<compile_context>
chip_gen: v7x
topology: tpu7x:2x2x1
jax: 0.10.0
libtpu: 0.0.40
codegen_flags: <defaults>
</compile_context>

<pallas_src>
import functools

import jax
import jax.numpy as jnp
from jax.experimental import pallas as pl
from jax.experimental.pallas import tpu as pltpu

N_STATE = 4
N_HIDDEN = 128
N_ACTION = 2
N_ACTION_PAD = 128          # lane-dense padded logit / output width

# Packed-weight row layout (bf16 tile = 16 sublanes, so keep block starts aligned).
R_W2 = 0                    # rows 0..127  : W2 zero-padded to 128 lanes
R_B2 = N_HIDDEN             # row 128      : b2 zero-padded to 128 lanes
R_W1 = 144                  # rows 144..147: W1 (tile-aligned start)
R_B1 = R_W1 + N_STATE       # row 148      : b1
W_ROWS = 160                # total rows (multiple of 16)


def _pnet_kernel(nv_ref, s_ref, w_ref, out_ref):
    # nv_ref : (1,)            i32 SMEM  number of valid batch rows (runtime scalar)
    # s_ref  : (bp, N_STATE)   f32 VMEM  state rows, zero-padded rows at the end
    # w_ref  : (W_ROWS, 128)  bf16 VMEM  packed W2|b2|W1|b1 (see layout above)
    # out_ref: (bp, 128)       f32 VMEM  softmax(logits, axis=0); real actions lanes 0..1
    bp = out_ref.shape[0]

    # ---- Layer 1 on the VPU: h = relu(s @ W1 + b1). K=4 is far too small for
    # the MXU systolic array, so do 4 broadcast FMAs instead (bias row folded in).
    w1b1 = w_ref[R_W1:R_B1 + 1, :].astype(jnp.float32)          # (5, 128): W1 rows + b1
    h = w1b1[N_STATE:N_STATE + 1, :] + s_ref[:, 0:1] * w1b1[0:1, :]
    for k in range(1, N_STATE):                                  # static unroll
        h = h + s_ref[:, k:k + 1] * w1b1[k:k + 1, :]
    h = jnp.maximum(h, 0.0)

    # ---- Layer 2 on the MXU, native bf16 operands, f32 accumulate:
    # logits = h @ W2 + b2, lane-dense (bp,128) @ (128,128).
    logits = jnp.dot(h.astype(jnp.bfloat16), w_ref[R_W2:R_W2 + N_HIDDEN, :],
                     preferred_element_type=jnp.float32)
    logits = logits + w_ref[R_B2:R_B2 + 1, :].astype(jnp.float32)

    # ---- Unconditional padded-row mask (n_valid is a runtime scalar): padded
    # rows must not pollute the axis-0 (dim=0) softmax max/sum.
    n_valid = nv_ref[0]
    row = jax.lax.broadcasted_iota(jnp.int32, (bp, N_ACTION_PAD), 0)
    logits = jnp.where(row < n_valid, logits, -jnp.inf)

    # ---- softmax over axis 0 (dim=0 in the PyTorch reference), numerically stable.
    m = jnp.max(logits, axis=0, keepdims=True)
    e = jnp.exp(logits - m)
    denom = jnp.sum(e, axis=0, keepdims=True)
    r = pl.reciprocal(denom, approx=True)        # EUP vrcp (free slot)
    r = r * (2.0 - denom * r)                    # one Newton-Raphson step (2 VPU ops)
    out_ref[...] = e * r


def pack_params(w1, b1, w2, b2):
    """Pack (pre-transposed) weights + biases into ONE bf16 VMEM-friendly array.

    w1: (N_STATE, N_HIDDEN)  = fc.weight.T     b1: (N_HIDDEN,)
    w2: (N_HIDDEN, N_ACTION) = out.weight.T    b2: (N_ACTION,)
    Call once, outside the eval loop.
    """
    wp = jnp.zeros((W_ROWS, N_ACTION_PAD), jnp.float32)
    wp = wp.at[R_W2:R_W2 + N_HIDDEN, :N_ACTION].set(w2.astype(jnp.float32))
    wp = wp.at[R_B2, :N_ACTION].set(jnp.reshape(b2, (-1,)).astype(jnp.float32))
    wp = wp.at[R_W1:R_W1 + N_STATE, :].set(w1.astype(jnp.float32))
    wp = wp.at[R_B1, :].set(jnp.reshape(b1, (-1,)).astype(jnp.float32))
    return wp.astype(jnp.bfloat16)


def pnet_forward(s, wpack, *, bp=None):
    """softmax(out(relu(fc(s))), dim=0).  s: (B, N_STATE) -> (B, N_ACTION) f32.

    bp: fixed batch bucket (multiple of 8).  All B <= bp share one compiled
    kernel because n_valid is a runtime SMEM scalar, not a baked constant.
    """
    B = s.shape[0]
    if bp is None:
        bp = max(8, ((B + 7) // 8) * 8)
    assert B <= bp and bp % 8 == 0, "batch exceeds bucket / bucket not sublane-aligned"

    s = s.astype(jnp.float32)
    if bp != B:
        s = jnp.pad(s, ((0, bp - B), (0, 0)))
    n_valid = jnp.full((1,), B, dtype=jnp.int32)

    out = pl.pallas_call(
        _pnet_kernel,
        out_shape=jax.ShapeDtypeStruct((bp, N_ACTION_PAD), jnp.float32),
        grid=(),  # tiny problem: single invocation, everything (<80 KB) fits in VMEM
        in_specs=[
            pl.BlockSpec(memory_space=pltpu.MemorySpace.SMEM),        # n_valid scalar
            pl.BlockSpec((bp, N_STATE), lambda: (0, 0)),              # states
            pl.BlockSpec((W_ROWS, N_ACTION_PAD), lambda: (0, 0)),     # packed weights
        ],
        out_specs=pl.BlockSpec((bp, N_ACTION_PAD), lambda: (0, 0)),
    )(n_valid, s, wpack)
    # Slice off batch padding and zero-padded action lanes; keep this inside the
    # caller's jit so XLA fuses it with the kernel output.
    return out[:B, :N_ACTION]


def init_params(key):
    # Deterministic init mimicking PyTorch's default Linear init:
    # U(-1/sqrt(fan_in), 1/sqrt(fan_in)). Weights stored pre-transposed.
    k1, k2, k3, k4 = jax.random.split(key, 4)
    bound1 = 1.0 / (N_STATE ** 0.5)
    bound2 = 1.0 / (N_HIDDEN ** 0.5)
    w1 = jax.random.uniform(k1, (N_STATE, N_HIDDEN), jnp.float32, -bound1, bound1)
    b1 = jax.random.uniform(k2, (N_HIDDEN,), jnp.float32, -bound1, bound1)
    w2 = jax.random.uniform(k3, (N_HIDDEN, N_ACTION), jnp.float32, -bound2, bound2)
    b2 = jax.random.uniform(k4, (N_ACTION,), jnp.float32, -bound2, bound2)
    return w1, b1, w2, b2


def pnet_reference(s, w1, b1, w2, b2):
    h = jnp.maximum(s @ w1 + b1, 0.0)
    logits = h @ w2 + b2
    return jax.nn.softmax(logits, axis=0)  # dim=0 as in the PyTorch module


if __name__ == "__main__":
    key = jax.random.PRNGKey(0)
    kp, kx = jax.random.split(key)
    w1, b1, w2, b2 = init_params(kp)
    wpack = pack_params(w1, b1, w2, b2)      # pack once, reuse across calls

    B = 8  # small batch of CartPole states (fits the default bp=8 bucket)
    s = jax.random.normal(kx, (B, N_STATE), jnp.float32)

    fwd = jax.jit(functools.partial(pnet_forward, bp=8))
    out = jax.block_until_ready(fwd(s, wpack))

    ref = pnet_reference(s, w1, b1, w2, b2)
    assert out.shape == (B, N_ACTION)
    # Tolerance covers bf16 weight storage + (refined) approximate reciprocal.
    assert jnp.allclose(out, ref, atol=5e-3, rtol=5e-3)
    # Columns of a dim=0 softmax sum to 1.
    assert jnp.allclose(out.sum(axis=0), jnp.ones((N_ACTION,), jnp.float32), atol=5e-3)

    print("KERNEL_OK")
</pallas_src>

<mosaic_0001>
module attributes {stable_mosaic.version = 11 : i64} {
  func.func @_pnet_kernel(%arg0: memref<1xi32, #tpu.memory_space<smem>>, %arg1: memref<8x4xf32, #tpu.memory_space<vmem>>, %arg2: memref<160x128xbf16, #tpu.memory_space<vmem>>, %arg3: memref<8x128xf32, #tpu.memory_space<vmem>>) attributes {dimension_semantics = [], scalar_prefetch = 0 : i64, scratch_operands = 0 : i64, tpu.core_type = #tpu.core_type<tc>} {
    %c144 = arith.constant 144 : index
    %c0 = arith.constant 0 : index
    %0 = vector.load %arg2[%c144, %c0] : memref<160x128xbf16, #tpu.memory_space<vmem>>, vector<5x128xbf16>
    %1 = arith.extf %0 : vector<5x128xbf16> to vector<5x128xf32>
    %2 = vector.extract_strided_slice %1 {offsets = [4, 0], sizes = [1, 128], strides = [1, 1]} : vector<5x128xf32> to vector<1x128xf32>
    %c0_0 = arith.constant 0 : index
    %c0_1 = arith.constant 0 : index
    %3 = vector.load %arg1[%c0_0, %c0_1] : memref<8x4xf32, #tpu.memory_space<vmem>>, vector<8x1xf32>
    %4 = vector.extract_strided_slice %1 {offsets = [0, 0], sizes = [1, 128], strides = [1, 1]} : vector<5x128xf32> to vector<1x128xf32>
    %5 = vector.broadcast %3 : vector<8x1xf32> to vector<8x128xf32>
    %6 = vector.broadcast %4 : vector<1x128xf32> to vector<8x128xf32>
    %7 = arith.mulf %5, %6 : vector<8x128xf32>
    %8 = vector.broadcast %2 : vector<1x128xf32> to vector<8x128xf32>
    %9 = arith.addf %8, %7 : vector<8x128xf32>
    %c0_2 = arith.constant 0 : index
    %c1 = arith.constant 1 : index
    %10 = vector.load %arg1[%c0_2, %c1] : memref<8x4xf32, #tpu.memory_space<vmem>>, vector<8x1xf32>
    %11 = vector.extract_strided_slice %1 {offsets = [1, 0], sizes = [1, 128], strides = [1, 1]} : vector<5x128xf32> to vector<1x128xf32>
    %12 = vector.broadcast %10 : vector<8x1xf32> to vector<8x128xf32>
    %13 = vector.broadcast %11 : vector<1x128xf32> to vector<8x128xf32>
    %14 = arith.mulf %12, %13 : vector<8x128xf32>
    %15 = arith.addf %9, %14 : vector<8x128xf32>
    %c0_3 = arith.constant 0 : index
    %c2 = arith.constant 2 : index
    %16 = vector.load %arg1[%c0_3, %c2] : memref<8x4xf32, #tpu.memory_space<vmem>>, vector<8x1xf32>
    %17 = vector.extract_strided_slice %1 {offsets = [2, 0], sizes = [1, 128], strides = [1, 1]} : vector<5x128xf32> to vector<1x128xf32>
    %18 = vector.broadcast %16 : vector<8x1xf32> to vector<8x128xf32>
    %19 = vector.broadcast %17 : vector<1x128xf32> to vector<8x128xf32>
    %20 = arith.mulf %18, %19 : vector<8x128xf32>
    %21 = arith.addf %15, %20 : vector<8x128xf32>
    %c0_4 = arith.constant 0 : index
    %c3 = arith.constant 3 : index
    %22 = vector.load %arg1[%c0_4, %c3] : memref<8x4xf32, #tpu.memory_space<vmem>>, vector<8x1xf32>
    %23 = vector.extract_strided_slice %1 {offsets = [3, 0], sizes = [1, 128], strides = [1, 1]} : vector<5x128xf32> to vector<1x128xf32>
    %24 = vector.broadcast %22 : vector<8x1xf32> to vector<8x128xf32>
    %25 = vector.broadcast %23 : vector<1x128xf32> to vector<8x128xf32>
    %26 = arith.mulf %24, %25 : vector<8x128xf32>
    %27 = arith.addf %21, %26 : vector<8x128xf32>
    %cst = arith.constant 0.000000e+00 : f32
    %28 = vector.broadcast %cst : f32 to vector<8x128xf32>
    %29 = arith.maximumf %27, %28 : vector<8x128xf32>
    %30 = arith.truncf %29 : vector<8x128xf32> to vector<8x128xbf16>
    %c0_5 = arith.constant 0 : index
    %c0_6 = arith.constant 0 : index
    %31 = vector.load %arg2[%c0_5, %c0_6] : memref<160x128xbf16, #tpu.memory_space<vmem>>, vector<128x128xbf16>
    %cst_7 = arith.constant dense<0.000000e+00> : vector<8x128xf32>
    %32 = tpu.matmul %30, %31, %cst_7 {dimension_numbers = #tpu.dot_dimension_numbers<[1], [0], [0], [1], [0, 0, 1, 1], [], []>} : vector<8x128xbf16>, vector<128x128xbf16>, vector<8x128xf32> -> vector<8x128xf32>
    %c128 = arith.constant 128 : index
    %c0_8 = arith.constant 0 : index
    %33 = vector.load %arg2[%c128, %c0_8] : memref<160x128xbf16, #tpu.memory_space<vmem>>, vector<1x128xbf16>
    %34 = arith.extf %33 : vector<1x128xbf16> to vector<1x128xf32>
    %35 = vector.broadcast %34 : vector<1x128xf32> to vector<8x128xf32>
    %36 = arith.addf %32, %35 : vector<8x128xf32>
    %c0_9 = arith.constant 0 : index
    %37 = memref.load %arg0[%c0_9] : memref<1xi32, #tpu.memory_space<smem>>
    %38 = tpu.iota {dimensions = array<i32: 0>} : vector<8x128xi32>
    %39 = vector.broadcast %37 : i32 to vector<8x128xi32>
    %40 = arith.cmpi slt, %38, %39 : vector<8x128xi32>
    %cst_10 = arith.constant 0xFF800000 : f32
    %41 = vector.broadcast %cst_10 : f32 to vector<8x128xf32>
    %42 = arith.select %40, %36, %41 : vector<8x128xi1>, vector<8x128xf32>
    %cst_11 = arith.constant dense<0xFF800000> : vector<128xf32>
    %43 = vector.multi_reduction <maximumf>, %42, %cst_11 [0] : vector<8x128xf32> to vector<128xf32>
    %44 = vector.shape_cast %43 : vector<128xf32> to vector<1x128xf32>
    %45 = vector.broadcast %44 : vector<1x128xf32> to vector<8x128xf32>
    %46 = arith.subf %42, %45 : vector<8x128xf32>
    %47 = math.exp %46 : vector<8x128xf32>
    %cst_12 = arith.constant dense<0.000000e+00> : vector<128xf32>
    %48 = vector.multi_reduction <add>, %47, %cst_12 [0] : vector<8x128xf32> to vector<128xf32>
    %49 = vector.shape_cast %48 : vector<128xf32> to vector<1x128xf32>
    %50 = tpu.reciprocal %49 {approx = true} : vector<1x128xf32> -> vector<1x128xf32>
    %51 = arith.mulf %49, %50 : vector<1x128xf32>
    %cst_13 = arith.constant 2.000000e+00 : f32
    %52 = vector.broadcast %cst_13 : f32 to vector<1x128xf32>
    %53 = arith.subf %52, %51 : vector<1x128xf32>
    %54 = arith.mulf %50, %53 : vector<1x128xf32>
    %55 = vector.broadcast %54 : vector<1x128xf32> to vector<8x128xf32>
    %56 = arith.mulf %47, %55 : vector<8x128xf32>
    %c0_14 = arith.constant 0 : index
    %c0_15 = arith.constant 0 : index
    %57 = vector.load %arg3[%c0_14, %c0_15] : memref<8x128xf32, #tpu.memory_space<vmem>>, vector<8x128xf32>
    tpu.vector_store %arg3[%c0_14, %c0_15], %56 {strides = array<i32>} : memref<8x128xf32, #tpu.memory_space<vmem>>, vector<8x128xf32>,
    return
  }
}

</mosaic_0001>

<bundles_post_ra>
// kernel: pnet_forward.1
= control target key start
LH: loop header
LB: loop body
LE: loop exit
PB: predicated region body
PF: predicated region fallthrough
CT: control target
= control target key end

     0   :  { %9 = vsyncpa [#allocation4], 0  ;;  %s309_s12 = smov [#allocation3]   ;;  %s359_s0 = inlined_call_operand.<no memory space> [shape: s32[1], index: 0, kind: input, shape index: {}]   ;;  %s360_s1 = inlined_call_operand.vmem [shape: f32[8,4], index: 1, kind: input, shape index: {}]   ;;  %s361_s2 = inlined_call_operand.hbm [shape: bf16[160,128], index: 2, kind: input, shape index: {}]   ;;  %s362_s3 = inlined_call_operand.vmem [shape: f32[8,128], index: 3, kind: output, shape index: {}]  }
   0x1   :  { %s19_s13 = sshll.u32 %s309_s12, 4  ;;  %s285_s16 = scalar_lea.hbm %s361_s2, 1280  ;;  %s20_s13 = int_to_ptr.vmem [resolvable:$true] %s19_s13 }
   0x2   :  { %p286_p0 = scmp.ne.s32.totalorder %s361_s2, %s285_s16  ;;  %p289_p1 = scmp.lt.u32.totalorder %s285_s16, %s361_s2 }
   0x4   :  { %p291_p2 = pnand %p289_p1, %p286_p0 }
   0x6   :  { %294 = shalt.err (!%p291_p2)
}
   0x7   :  { %s295_s21 = scalar_lea.vmem %s20_s13, 1280  ;;  %p300_p4 = scmp.lt.s32.totalorder %s20_s13, %s20_s13 }
   0x8   :  { %p296_p3 = scmp.ne.s32.totalorder %s20_s13, %s295_s21  ;;  %p301_p5 = scmp.lt.s32.totalorder %s295_s21, %s295_s21 }
   0xa   :  { %p302_p6 = por %p301_p5, %p300_p4 }
   0xc   :  { %p303_p7 = pnand %p302_p6, %p296_p3 }
   0xe   :  { %306 = shalt.err (!%p303_p7)
}
   0xf   :  { %s310_s22 = smov 64   ;;  %s311_s23 = smov 4  }
  0x10   :  { %25 = dma.hbm_to_vmem [thread:$0]  %s361_s2, 1280, %s20_s13, [#allocation4], %s310_s22, %s310_s22, %s311_s23  }
  0x11   :  { %307 = dma.done.wait [#allocation4], 1280  }
  0x12   :  { %308 = vsyncadd [#allocation4], 4294966016  ;;  %v312_v0 = vmov 0   ;;  %v313_v1 = vmov 2   ;;  %v314_v2 = vmov 0.0   ;;  %v32_v3 = vld [vmem:[%s360_s1] sm:$0xff]  ;;  %v38_v14 = vlaneseq }
  0x13   :  { %268 = vset.pattern.permute.xlu0 %v312_v0  ;;  %270 = vset.pattern.permute.xlu1 %v313_v1  ;;  %v273_v4 = vld [vmem:[#allocation3] sm:$0xff]   ;;  %v274_v5 = vld [vmem:[#allocation3 + $0x8] sm:$0xff]   ;;  %v315_v6 = vmov 1   ;;  %v316_v7 = vmov 3   ;;  %v275_v8 = vld [vmem:[#allocation3 + $0x10] sm:$0xff]   ;;  %vm317_vm0 = vmmov 0   ;;  %v193_v45 = vstv %s359_s0 }
  0x14   :  { %239 = vmatprep.subr.bf16.mxu0 %v314_v2  ;;  %35 = vperm.xlu0 %268, %v32_v3   ;;  %v276_v9 = vld [vmem:[#allocation3 + $0x18] sm:$0xff]   ;;  %v277_v10 = vld [vmem:[#allocation3 + $0x20] sm:$0xff]   ;;  %v278_v11 = vld [vmem:[#allocation3 + $0x28] sm:$0xff]   ;;  %v39_v15 = vshrl.u32 %v38_v14, 7 }
  0x15   :  { %59 = vperm.xlu1 %270, %v32_v3   ;;  %240 = vmatpush3.bf16.msra.mxu0 %v273_v4  ;;  %v279_v12 = vld [vmem:[#allocation3 + $0x30] sm:$0xff]   ;;  %v280_v13 = vld [vmem:[#allocation3 + $0x38] sm:$0xff]   ;;  %v30_v16 = vld [vmem:[#allocation3 + $0x48] sm:$0x7] }
  0x16   :  { %241 = vmatprep.subr.bf16.mxu0 %v314_v2  ;;  %255 = vmatprep.mubr.msk.bf16.mxu0 %vm317_vm0, %v314_v2  ;;  %v40_v17 = vsub.s32 0, %v39_v15  ;;  %v31_v18 = vunpack.c.l.bf16 %v30_v16  ;;  %v45_v19 = vsub.s32 4, %v39_v15  ;;  %v54_v21 = vsub.s32 1, %v39_v15  ;;  %v96_v42 = vld [vmem:[#allocation3 + $0x40] sm:$0x1] }
  0x17   :  { %v64_v23 = vsub.s32 2, %v39_v15  ;;  %v74_v25 = vsub.s32 3, %v39_v15  ;;  %v97_v43 = vunpack.c.l.bf16 %v96_v42  ;;  %vm194_vm1 = vcmp.lt.s32.totalorder %v39_v15, %v193_v45 }
  0x18   :  { %269 = vset.pattern.permute.xlu0 %v315_v6  ;;  %v41_v20 = vrot.slane %v31_v18, %v40_v17  ;;  %v46_v27 = vrot.slane %v31_v18, %v45_v19  ;;  %v55_v28 = vrot.slane %v31_v18, %v54_v21 }
  0x19   :  { %271 = vset.pattern.permute.xlu1 %v316_v7  ;;  %49 = vperm.xlu0 %269, %v32_v3   ;;  %v65_v29 = vrot.slane %v31_v18, %v64_v23  ;;  %v75_v30 = vrot.slane %v31_v18, %v74_v25  ;;  %v101_v44 = vrot.slane %v97_v43, %v40_v17 }
  0x1a   :  { %69 = vperm.xlu1 %271, %v32_v3   ;;  %242 = vmatpush3.bf16.msra.mxu0 %v274_v5 }
  0x1b   :  { %243 = vmatprep.subr.bf16.mxu0 %v314_v2 }
  0x1d   :  { %272 = vset.pattern.permute.xlu0 %v316_v7 }
  0x1e   :  { %244 = vmatpush3.bf16.msra.mxu0 %v275_v8 }
  0x1f   :  { %245 = vmatprep.subr.bf16.mxu0 %v314_v2 }
  0x22   :  { %246 = vmatpush3.bf16.msra.mxu0 %v276_v9 }
  0x23   :  { %247 = vmatprep.subr.bf16.mxu0 %v314_v2 }
  0x26   :  { %248 = vmatpush3.bf16.msra.mxu0 %v277_v10 }
  0x27   :  { %249 = vmatprep.subr.bf16.mxu0 %v314_v2 }
  0x2a   :  { %250 = vmatpush3.bf16.msra.mxu0 %v278_v11 }
  0x2b   :  { %251 = vmatprep.subr.bf16.mxu0 %v314_v2 }
  0x2e   :  { %252 = vmatpush3.bf16.msra.mxu0 %v279_v12 }
  0x2f   :  { %253 = vmatprep.subr.bf16.mxu0 %v314_v2 }
  0x32   :  { %254 = vmatpush3.bf16.msra.mxu0 %v280_v13 }
  0x93   :  { %v36_v22 = vpop.permute.xlu0 %35 }
  0x94   :  { %v60_v24 = vpop.permute.xlu1 %59  ;;  %v42_v26 = vmul.f32 %v41_v20, %v36_v22 }
  0x95   :  { %v66_v35 = vmul.f32 %v65_v29, %v60_v24 }
  0x96   :  { %v47_v33 = vadd.f32 %v46_v27, %v42_v26 }
  0x98   :  { %v50_v31 = vpop.permute.xlu0 %49 }
  0x99   :  { %v70_v32 = vpop.permute.xlu1 %69  ;;  %v56_v34 = vmul.f32 %v55_v28, %v50_v31 }
  0x9a   :  { %v76_v37 = vmul.f32 %v75_v30, %v70_v32 }
  0x9b   :  { %v57_v36 = vadd.f32 %v56_v34, %v47_v33 }
  0x9d   :  { %v67_v38 = vadd.f32 %v66_v35, %v57_v36 }
  0x9f   :  { %v77_v39 = vadd.f32 %v76_v37, %v67_v38 }
  0xa1   :  { %v78_v40 = vmax.f32 %v77_v39, 0.0 }
  0xa3   :  { %v79_v41 = vpack.c.bf16 %v78_v40, %v78_v40 }
  0xa5   :  { %256 = vmatmul.mubr.bf16.vlgmr.msra.gmra.mrb[0].mxu0 %v79_v41 }
 0x178   :  { %v184_v46 = vpop.f32.mrb[0].mxu0 }
 0x179   :  { %v185_v47 = vadd.f32 %v184_v46, %v101_v44  ;;  %v257_v48 = vpop.f32.mrb[1].mxu0 }
 0x17a   :  { %v187_v49 = vpop.f32.mrb[2].mxu0 }
 0x17b   :  { %v195_v50 = vsel %vm194_vm1, %v185_v47, -inf  ;;  %v258_v51 = vpop.f32.mrb[3].mxu0 }
 0x17c   :  { %v196_v52 = vrot.slane %v195_v50, 4 }
 0x17e   :  { %v197_v53 = vmax.f32 %v195_v50, %v196_v52 }
 0x180   :  { %v198_v54 = vrot.slane %v197_v53, 2 }
 0x182   :  { %v199_v55 = vmax.f32 %v197_v53, %v198_v54 }
 0x184   :  { %v200_v56 = vrot.slane %v199_v55, 1 }
 0x186   :  { %v201_v57 = vmax.f32 %v199_v55, %v200_v56 }
 0x188   :  { %v202_v58 = vsub.f32 %v195_v50, %v201_v57 }
 0x18a   :  { %v203_v59 = vmul.f32 1.442695, %v202_v58 }
 0x18c   :  { %281 = vpow2.f32 %v203_v59 }
 0x196   :  { %v282_v60 = vpop.eup %281 }
 0x197   :  { %v205_v61 = vrot.slane %v282_v60, 4 }
 0x199   :  { %v206_v62 = vadd.f32 %v282_v60, %v205_v61 }
 0x19b   :  { %v207_v63 = vrot.slane %v206_v62, 2 }
 0x19d   :  { %v208_v0 = vadd.f32 %v207_v63, %v206_v62 }
 0x19f   :  { %v209_v1 = vrot.slane %v208_v0, 1 }
 0x1a1   :  { %v210_v2 = vadd.f32 %v209_v1, %v208_v0 }
 0x1a3   :  { %283 = vrcp.f32 %v210_v2 }
 0x1ad   :  { %v284_v3 = vpop.eup %283 }
 0x1ae   :  { %v212_v4 = vmul.f32 %v284_v3, %v210_v2 }
 0x1b0   :  { %v213_v5 = vsub.f32 2.0, %v212_v4 }
 0x1b2   :  { %v214_v6 = vmul.f32 %v284_v3, %v213_v5 }
 0x1b4   :  { %v215_v7 = vmul.f32 %v282_v60, %v214_v6 }
 0x1b6   :  { %216 = vst [vmem:[%s362_s3] sm:$0xff] %v215_v7 }
 0x1b7   :  { %221 = vsyncpa [#allocation4], 1 }

</bundles_post_ra>
